<compile_context>
chip_gen: v5e
topology: v5e:2x2
jax: 0.10.0
libtpu: 0.0.40
codegen_flags: <defaults>
</compile_context>

<pallas_src>
import math
from functools import partial

import jax
import jax.numpy as jnp
from jax import lax
from jax.experimental import pallas as pl
from jax.experimental.pallas import tpu as pltpu


def _round_up(v, m):
    return (v + m - 1) // m * m


def _cdiv(a, b):
    return -(-a // b)


def _vmem_capacity_bytes():
    """Per-TensorCore VMEM capacity; conservative 64 MiB fallback (v7x-safe)."""
    try:
        cap = int(pltpu.get_tpu_info().vmem_capacity_bytes)
        if cap > 0:
            return cap
    except Exception:
        pass
    return 64 * 1024 * 1024


def _maybe_single_buffered(block_shape, index_map, single_buffer):
    """BlockSpec that is single-buffered when the block is grid-invariant."""
    if single_buffer and hasattr(pl, "Buffered"):
        try:
            return pl.BlockSpec(block_shape, index_map, pipeline_mode=pl.Buffered(1))
        except Exception:
            pass
    return pl.BlockSpec(block_shape, index_map)


def _mlp_kernel(x_ref, gamma_ref, beta_ref, w1_ref, b1_ref, w2_ref, b2_ref,
                out_ref, xn_ref, acc_ref, *, eps, use_residual, approximate_gelu):
    k = pl.program_id(1)
    nk = pl.num_programs(1)

    # First hidden chunk for this row tile: LayerNorm once, zero the accumulator.
    @pl.when(k == 0)
    def _():
        x = x_ref[...].astype(jnp.float32)
        mean = jnp.mean(x, axis=-1, keepdims=True)
        xc = x - mean
        var = jnp.mean(xc * xc, axis=-1, keepdims=True)     # two-pass: no cancellation
        xn = xc * lax.rsqrt(var + eps)
        xn = xn * gamma_ref[...] + beta_ref[...]
        xn_ref[...] = xn.astype(xn_ref.dtype)                # cache as bf16 for the MXU
        acc_ref[...] = jnp.zeros_like(acc_ref)

    # fc1 chunk (+ bias) and GELU, elementwise math in f32.
    h = jnp.dot(xn_ref[...], w1_ref[...],
                preferred_element_type=jnp.float32) + b1_ref[...]
    if approximate_gelu:
        h = jax.nn.gelu(h, approximate=True)                 # tanh -> EUP slot
    else:
        h = 0.5 * h * (1.0 + lax.erf(h * (1.0 / math.sqrt(2.0))))  # exact nn.GELU()

    # fc2 partial product, accumulated in f32.
    acc_ref[...] += jnp.dot(h.astype(w2_ref.dtype), w2_ref[...],
                            preferred_element_type=jnp.float32)

    # Last hidden chunk: bias, residual, writeback.
    @pl.when(k == nk - 1)
    def _():
        y = acc_ref[...] + b2_ref[...]
        if use_residual:
            y = y + x_ref[...].astype(jnp.float32)
        out_ref[...] = y.astype(out_ref.dtype)


def mlp_pallas(x, params, *, use_residual=True, eps=1e-5,
               block_rows=None, hidden_tile=512,
               matmul_dtype=jnp.bfloat16, approximate_gelu=False):
    """Fused LayerNorm -> fc1 -> GELU -> fc2 (-> + residual).

    x: (..., in_dim).  params: dict with
      gamma, beta: (in_dim,)        LayerNorm affine
      w1: (in_dim, hidden_dim)      b1: (hidden_dim,)
      w2: (hidden_dim, out_dim)     b2: (out_dim,)
    """
    in_dim = x.shape[-1]
    hidden_dim = params["w1"].shape[1]
    out_dim = params["w2"].shape[1]
    if use_residual:
        assert in_dim == out_dim

    orig_shape = x.shape
    out_dtype = x.dtype
    x2 = x.reshape(-1, in_dim)            # native dtype; cast happens in-kernel
    n = x2.shape[0]

    mm_size = jnp.dtype(matmul_dtype).itemsize
    x_size = jnp.dtype(x.dtype).itemsize
    out_size = jnp.dtype(out_dtype).itemsize

    # ------------- tile selection under the per-core VMEM budget -------------
    vmem_cap = _vmem_capacity_bytes()
    budget = max(32 << 20, vmem_cap - (8 << 20))

    w_bytes = (in_dim * hidden_dim + hidden_dim * out_dim) * mm_size
    weights_resident = w_bytes <= budget // 2

    if weights_resident:
        # Single hidden chunk -> weight index maps are grid-invariant -> DMA'd once.
        th = hidden_dim
        hp = hidden_dim
        w_buffers = 1            # single-buffered via pl.Buffered(1)
    else:
        # Stream the hidden dim in deep chunks (>=256, default 512).
        th = max(256, _round_up(min(hidden_tile, hidden_dim), 256))
        hp = _round_up(hidden_dim, th)
        w_buffers = 2

    fixed_bytes = (w_buffers * (in_dim * th + th * out_dim) * mm_size
                   + 2 * (2 * in_dim + th + out_dim) * 4)    # gamma/beta/b1/b2
    per_row_bytes = (2 * in_dim * x_size       # x tile (double-buffered)
                     + 2 * out_dim * out_size  # out tile (double-buffered)
                     + in_dim * mm_size        # LN-output scratch
                     + out_dim * 4)            # fc2 f32 accumulator
    bm_cap = max(8, (budget - fixed_bytes) // per_row_bytes)
    bm = min(block_rows if block_rows is not None
             else (512 if weights_resident else 1024),
             bm_cap, 1024)
    bm = (bm // 128 * 128) if bm >= 128 else max(8, bm // 8 * 8)
    bm = min(bm, _round_up(n, 8))
    # Keep >= 2 row tiles so the parallel axis can shard across TensorCores (v7x).
    if n > 8 and _cdiv(n, bm) < 2:
        bm = max(8, _round_up(_cdiv(n, 2), 8))

    n_row_tiles = _cdiv(n, bm)
    n_pad = n_row_tiles * bm
    if n_pad != n:                           # only pad rows when bm does not divide n
        x2 = jnp.pad(x2, ((0, n_pad - n), (0, 0)))

    # ------------- parameters (feature dims stay unpadded / full-dim blocks) ----
    gamma = params["gamma"].astype(jnp.float32).reshape(1, in_dim)
    beta = params["beta"].astype(jnp.float32).reshape(1, in_dim)
    w1 = params["w1"].astype(matmul_dtype)
    b1 = params["b1"].astype(jnp.float32).reshape(1, hidden_dim)
    w2 = params["w2"].astype(matmul_dtype)
    b2 = params["b2"].astype(jnp.float32).reshape(1, out_dim)
    if hp != hidden_dim:                     # zero hidden padding is exact (GELU(0)*0)
        w1 = jnp.pad(w1, ((0, 0), (0, hp - hidden_dim)))
        b1 = jnp.pad(b1, ((0, 0), (0, hp - hidden_dim)))
        w2 = jnp.pad(w2, ((0, hp - hidden_dim), (0, 0)))

    grid = (n_row_tiles, hp // th)

    vmem_est = fixed_bytes + bm * per_row_bytes
    vmem_limit = int(min(vmem_cap, max(vmem_est + (8 << 20), 32 << 20)))

    weight_passes = 1 if weights_resident else n_row_tiles
    cost = pl.CostEstimate(
        flops=int(2 * n_pad * in_dim * hp + 2 * n_pad * hp * out_dim),
        transcendentals=int(n_pad * hp),
        bytes_accessed=int(n_pad * in_dim * x_size + n_pad * out_dim * out_size
                           + weight_passes * (w1.nbytes + w2.nbytes)
                           + gamma.nbytes + beta.nbytes + b1.nbytes + b2.nbytes),
    )

    kernel = partial(_mlp_kernel, eps=eps, use_residual=use_residual,
                     approximate_gelu=approximate_gelu)

    out = pl.pallas_call(
        kernel,
        out_shape=jax.ShapeDtypeStruct((n_pad, out_dim), out_dtype),
        grid_spec=pltpu.PrefetchScalarGridSpec(
            num_scalar_prefetch=0,
            grid=grid,
            in_specs=[
                pl.BlockSpec((bm, in_dim), lambda i, k: (i, 0)),          # x rows
                pl.BlockSpec((1, in_dim), lambda i, k: (0, 0)),           # gamma
                pl.BlockSpec((1, in_dim), lambda i, k: (0, 0)),           # beta
                _maybe_single_buffered((in_dim, th), lambda i, k: (0, k),
                                       weights_resident),                 # w1 chunk
                _maybe_single_buffered((1, th), lambda i, k: (0, k),
                                       weights_resident),                 # b1 chunk
                _maybe_single_buffered((th, out_dim), lambda i, k: (k, 0),
                                       weights_resident),                 # w2 chunk
                pl.BlockSpec((1, out_dim), lambda i, k: (0, 0)),          # b2
            ],
            out_specs=pl.BlockSpec((bm, out_dim), lambda i, k: (i, 0)),
            scratch_shapes=[
                pltpu.VMEM((bm, in_dim), matmul_dtype),    # cached LN output
                pltpu.VMEM((bm, out_dim), jnp.float32),    # fc2 accumulator
            ],
        ),
        compiler_params=pltpu.CompilerParams(
            dimension_semantics=("parallel", "arbitrary"),
            vmem_limit_bytes=vmem_limit,
        ),
        cost_estimate=cost,
    )(x2, gamma, beta, w1, b1, w2, b2)

    if n_pad != n:
        out = out[:n]
    return out.reshape(*orig_shape[:-1], out_dim)


def make_params(key, in_dim, hidden_dim, out_dim):
    k1, k2, k3, k4 = jax.random.split(key, 4)
    # nn.Linear stores weight as (out, in); keep it (in, out) so the kernel does x @ W.
    w1 = jax.random.normal(k1, (in_dim, hidden_dim), jnp.float32) * 0.05
    b1 = jax.random.normal(k2, (hidden_dim,), jnp.float32) * 0.05
    w2 = jax.random.normal(k3, (hidden_dim, out_dim), jnp.float32) * 0.05
    b2 = jax.random.normal(k4, (out_dim,), jnp.float32) * 0.05
    gamma = jnp.ones((in_dim,), jnp.float32)
    beta = jnp.zeros((in_dim,), jnp.float32)
    return dict(gamma=gamma, beta=beta, w1=w1, b1=b1, w2=w2, b2=b2)


def mlp_reference(x, params, *, use_residual=True, eps=1e-5):
    xf = x.astype(jnp.float32)
    mean = jnp.mean(xf, axis=-1, keepdims=True)
    var = jnp.mean((xf - mean) ** 2, axis=-1, keepdims=True)
    xn = (xf - mean) * lax.rsqrt(var + eps) * params["gamma"] + params["beta"]
    h = xn @ params["w1"] + params["b1"]
    h = 0.5 * h * (1.0 + lax.erf(h / math.sqrt(2.0)))
    y = h @ params["w2"] + params["b2"]
    if use_residual:
        y = y + xf
    return y.astype(x.dtype)


if __name__ == "__main__":
    in_dim = out_dim = 32
    hidden_dim = 64
    batch, seq = 2, 8

    key = jax.random.PRNGKey(0)
    kx, kp = jax.random.split(key)
    x = jax.random.normal(kx, (batch, seq, in_dim), jnp.float32)
    params = make_params(kp, in_dim, hidden_dim, out_dim)

    out = mlp_pallas(x, params, use_residual=True)
    out = jax.block_until_ready(out)

    ref = mlp_reference(x, params, use_residual=True)
    assert out.shape == (batch, seq, out_dim)
    # bf16 MXU operands with f32 accumulation -> ~1e-2-level agreement expected.
    assert jnp.allclose(out, ref, atol=2e-2, rtol=2e-2), "mismatch vs reference"

    print("KERNEL_OK")
</pallas_src>

<mosaic_0001>
module attributes {stable_mosaic.version = 11 : i64} {
  func.func @_mlp_kernel(%arg0: i32, %arg1: i32, %arg2: memref<8x32xf32, #tpu.memory_space<vmem>>, %arg3: memref<1x32xf32, #tpu.memory_space<vmem>>, %arg4: memref<1x32xf32, #tpu.memory_space<vmem>>, %arg5: memref<32x64xbf16, #tpu.memory_space<vmem>>, %arg6: memref<1x64xf32, #tpu.memory_space<vmem>>, %arg7: memref<64x32xbf16, #tpu.memory_space<vmem>>, %arg8: memref<1x32xf32, #tpu.memory_space<vmem>>, %arg9: memref<8x32xf32, #tpu.memory_space<vmem>>, %arg10: memref<8x32xbf16, #tpu.memory_space<vmem>>, %arg11: memref<8x32xf32, #tpu.memory_space<vmem>>) attributes {dimension_semantics = [#tpu.dimension_semantics<parallel>, #tpu.dimension_semantics<arbitrary>], iteration_bounds = array<i64: 2, 1>, scalar_prefetch = 0 : i64, scratch_operands = 2 : i64, tpu.core_type = #tpu.core_type<tc>, window_params = [{transform_indices = @transform_0, window_bounds = array<i64: 8, 32>}, {pipeline_mode = #tpu.pipeline_mode<synchronous>, transform_indices = @transform_1, window_bounds = array<i64: 1, 32>}, {pipeline_mode = #tpu.pipeline_mode<synchronous>, transform_indices = @transform_2, window_bounds = array<i64: 1, 32>}, {pipeline_mode = #tpu.pipeline_mode<synchronous>, transform_indices = @transform_3, window_bounds = array<i64: 32, 64>}, {pipeline_mode = #tpu.pipeline_mode<synchronous>, transform_indices = @transform_4, window_bounds = array<i64: 1, 64>}, {pipeline_mode = #tpu.pipeline_mode<synchronous>, transform_indices = @transform_5, window_bounds = array<i64: 64, 32>}, {pipeline_mode = #tpu.pipeline_mode<synchronous>, transform_indices = @transform_6, window_bounds = array<i64: 1, 32>}, {transform_indices = @transform_7, window_bounds = array<i64: 8, 32>}]} {
    %c0_i32 = arith.constant 0 : i32
    %0 = arith.cmpi eq, %arg1, %c0_i32 : i32
    %1 = arith.extui %0 : i1 to i32
    %c0_i32_0 = arith.constant 0 : i32
    %2 = arith.cmpi ne, %1, %c0_i32_0 : i32
    scf.if %2 {
      %c0_18 = arith.constant 0 : index
      %c0_19 = arith.constant 0 : index
      %26 = vector.load %arg2[%c0_18, %c0_19] : memref<8x32xf32, #tpu.memory_space<vmem>>, vector<8x32xf32>
      %cst_20 = arith.constant dense<0.000000e+00> : vector<8xf32>
      %27 = vector.multi_reduction <add>, %26, %cst_20 [1] : vector<8x32xf32> to vector<8xf32>
      %28 = vector.shape_cast %27 : vector<8xf32> to vector<8x1xf32>
      %cst_21 = arith.constant 3.200000e+01 : f32
      %29 = vector.broadcast %cst_21 : f32 to vector<8x1xf32>
      %30 = arith.divf %28, %29 : vector<8x1xf32>
      %31 = vector.broadcast %30 : vector<8x1xf32> to vector<8x32xf32>
      %32 = arith.subf %26, %31 : vector<8x32xf32>
      %33 = arith.mulf %32, %32 : vector<8x32xf32>
      %cst_22 = arith.constant dense<0.000000e+00> : vector<8xf32>
      %34 = vector.multi_reduction <add>, %33, %cst_22 [1] : vector<8x32xf32> to vector<8xf32>
      %35 = vector.shape_cast %34 : vector<8xf32> to vector<8x1xf32>
      %cst_23 = arith.constant 3.200000e+01 : f32
      %36 = vector.broadcast %cst_23 : f32 to vector<8x1xf32>
      %37 = arith.divf %35, %36 : vector<8x1xf32>
      %cst_24 = arith.constant 9.99999974E-6 : f32
      %38 = vector.broadcast %cst_24 : f32 to vector<8x1xf32>
      %39 = arith.addf %37, %38 : vector<8x1xf32>
      %40 = math.rsqrt %39 : vector<8x1xf32>
      %41 = vector.broadcast %40 : vector<8x1xf32> to vector<8x32xf32>
      %42 = arith.mulf %32, %41 : vector<8x32xf32>
      %c0_25 = arith.constant 0 : index
      %c0_26 = arith.constant 0 : index
      %43 = vector.load %arg3[%c0_25, %c0_26] : memref<1x32xf32, #tpu.memory_space<vmem>>, vector<1x32xf32>
      %44 = vector.broadcast %43 : vector<1x32xf32> to vector<8x32xf32>
      %45 = arith.mulf %42, %44 : vector<8x32xf32>
      %c0_27 = arith.constant 0 : index
      %c0_28 = arith.constant 0 : index
      %46 = vector.load %arg4[%c0_27, %c0_28] : memref<1x32xf32, #tpu.memory_space<vmem>>, vector<1x32xf32>
      %47 = vector.broadcast %46 : vector<1x32xf32> to vector<8x32xf32>
      %48 = arith.addf %45, %47 : vector<8x32xf32>
      %49 = arith.truncf %48 : vector<8x32xf32> to vector<8x32xbf16>
      %c0_29 = arith.constant 0 : index
      %c0_30 = arith.constant 0 : index
      %50 = vector.load %arg10[%c0_29, %c0_30] : memref<8x32xbf16, #tpu.memory_space<vmem>>, vector<8x32xbf16>
      tpu.vector_store %arg10[%c0_29, %c0_30], %49 {strides = array<i32>} : memref<8x32xbf16, #tpu.memory_space<vmem>>, vector<8x32xbf16>,
      %cst_31 = arith.constant 0.000000e+00 : f32
      %51 = vector.broadcast %cst_31 : f32 to vector<8x32xf32>
      %c0_32 = arith.constant 0 : index
      %c0_33 = arith.constant 0 : index
      %52 = vector.load %arg11[%c0_32, %c0_33] : memref<8x32xf32, #tpu.memory_space<vmem>>, vector<8x32xf32>
      tpu.vector_store %arg11[%c0_32, %c0_33], %51 {strides = array<i32>} : memref<8x32xf32, #tpu.memory_space<vmem>>, vector<8x32xf32>,
    } else {
    }
    %c0 = arith.constant 0 : index
    %c0_1 = arith.constant 0 : index
    %3 = vector.load %arg10[%c0, %c0_1] : memref<8x32xbf16, #tpu.memory_space<vmem>>, vector<8x32xbf16>
    %c0_2 = arith.constant 0 : index
    %c0_3 = arith.constant 0 : index
    %4 = vector.load %arg5[%c0_2, %c0_3] : memref<32x64xbf16, #tpu.memory_space<vmem>>, vector<32x64xbf16>
    %cst = arith.constant dense<0.000000e+00> : vector<8x64xf32>
    %5 = tpu.matmul %3, %4, %cst {dimension_numbers = #tpu.dot_dimension_numbers<[1], [0], [0], [1], [0, 0, 1, 1], [], []>} : vector<8x32xbf16>, vector<32x64xbf16>, vector<8x64xf32> -> vector<8x64xf32>
    %c0_4 = arith.constant 0 : index
    %c0_5 = arith.constant 0 : index
    %6 = vector.load %arg6[%c0_4, %c0_5] : memref<1x64xf32, #tpu.memory_space<vmem>>, vector<1x64xf32>
    %7 = vector.broadcast %6 : vector<1x64xf32> to vector<8x64xf32>
    %8 = arith.addf %5, %7 : vector<8x64xf32>
    %cst_6 = arith.constant 5.000000e-01 : f32
    %9 = vector.broadcast %cst_6 : f32 to vector<8x64xf32>
    %10 = arith.mulf %9, %8 : vector<8x64xf32>
    %cst_7 = arith.constant 0.707106769 : f32
    %11 = vector.broadcast %cst_7 : f32 to vector<8x64xf32>
    %12 = arith.mulf %8, %11 : vector<8x64xf32>
    %13 = math.erf %12 : vector<8x64xf32>
    %cst_8 = arith.constant 1.000000e+00 : f32
    %14 = vector.broadcast %cst_8 : f32 to vector<8x64xf32>
    %15 = arith.addf %14, %13 : vector<8x64xf32>
    %16 = arith.mulf %10, %15 : vector<8x64xf32>
    %c0_9 = arith.constant 0 : index
    %c0_10 = arith.constant 0 : index
    %17 = vector.load %arg11[%c0_9, %c0_10] : memref<8x32xf32, #tpu.memory_space<vmem>>, vector<8x32xf32>
    %18 = arith.truncf %16 : vector<8x64xf32> to vector<8x64xbf16>
    %c0_11 = arith.constant 0 : index
    %c0_12 = arith.constant 0 : index
    %19 = vector.load %arg7[%c0_11, %c0_12] : memref<64x32xbf16, #tpu.memory_space<vmem>>, vector<64x32xbf16>
    %cst_13 = arith.constant dense<0.000000e+00> : vector<8x32xf32>
    %20 = tpu.matmul %18, %19, %cst_13 {dimension_numbers = #tpu.dot_dimension_numbers<[1], [0], [0], [1], [0, 0, 1, 1], [], []>} : vector<8x64xbf16>, vector<64x32xbf16>, vector<8x32xf32> -> vector<8x32xf32>
    %21 = arith.addf %17, %20 : vector<8x32xf32>
    %c0_14 = arith.constant 0 : index
    %c0_15 = arith.constant 0 : index
    %22 = vector.load %arg11[%c0_14, %c0_15] : memref<8x32xf32, #tpu.memory_space<vmem>>, vector<8x32xf32>
    tpu.vector_store %arg11[%c0_14, %c0_15], %21 {strides = array<i32>} : memref<8x32xf32, #tpu.memory_space<vmem>>, vector<8x32xf32>,
    %c0_i32_16 = arith.constant 0 : i32
    %23 = arith.cmpi eq, %arg1, %c0_i32_16 : i32
    %24 = arith.extui %23 : i1 to i32
    %c0_i32_17 = arith.constant 0 : i32
    %25 = arith.cmpi ne, %24, %c0_i32_17 : i32
    scf.if %25 {
      %c0_18 = arith.constant 0 : index
      %c0_19 = arith.constant 0 : index
      %26 = vector.load %arg11[%c0_18, %c0_19] : memref<8x32xf32, #tpu.memory_space<vmem>>, vector<8x32xf32>
      %c0_20 = arith.constant 0 : index
      %c0_21 = arith.constant 0 : index
      %27 = vector.load %arg8[%c0_20, %c0_21] : memref<1x32xf32, #tpu.memory_space<vmem>>, vector<1x32xf32>
      %28 = vector.broadcast %27 : vector<1x32xf32> to vector<8x32xf32>
      %29 = arith.addf %26, %28 : vector<8x32xf32>
      %c0_22 = arith.constant 0 : index
      %c0_23 = arith.constant 0 : index
      %30 = vector.load %arg2[%c0_22, %c0_23] : memref<8x32xf32, #tpu.memory_space<vmem>>, vector<8x32xf32>
      %31 = arith.addf %29, %30 : vector<8x32xf32>
      %c0_24 = arith.constant 0 : index
      %c0_25 = arith.constant 0 : index
      %32 = vector.load %arg9[%c0_24, %c0_25] : memref<8x32xf32, #tpu.memory_space<vmem>>, vector<8x32xf32>
      tpu.vector_store %arg9[%c0_24, %c0_25], %31 {strides = array<i32>} : memref<8x32xf32, #tpu.memory_space<vmem>>, vector<8x32xf32>,
    } else {
    }
    return
  }
  func.func @transform_0(%arg0: i32, %arg1: i32) -> (i32, i32) {
    %c0_i32 = arith.constant 0 : i32
    %c0_i32_0 = arith.constant 0 : i32
    return %arg0, %c0_i32 : i32, i32
  }
  func.func @transform_1(%arg0: i32, %arg1: i32) -> (i32, i32) {
    %c0_i32 = arith.constant 0 : i32
    %c0_i32_0 = arith.constant 0 : i32
    %c0_i32_1 = arith.constant 0 : i32
    return %c0_i32, %c0_i32_0 : i32, i32
  }
  func.func @transform_2(%arg0: i32, %arg1: i32) -> (i32, i32) {
    %c0_i32 = arith.constant 0 : i32
    %c0_i32_0 = arith.constant 0 : i32
    %c0_i32_1 = arith.constant 0 : i32
    return %c0_i32, %c0_i32_0 : i32, i32
  }
  func.func @transform_3(%arg0: i32, %arg1: i32) -> (i32, i32) {
    %c0_i32 = arith.constant 0 : i32
    %c0_i32_0 = arith.constant 0 : i32
    return %c0_i32, %arg1 : i32, i32
  }
  func.func @transform_4(%arg0: i32, %arg1: i32) -> (i32, i32) {
    %c0_i32 = arith.constant 0 : i32
    %c0_i32_0 = arith.constant 0 : i32
    return %c0_i32, %arg1 : i32, i32
  }
  func.func @transform_5(%arg0: i32, %arg1: i32) -> (i32, i32) {
    %c0_i32 = arith.constant 0 : i32
    %c0_i32_0 = arith.constant 0 : i32
    return %arg1, %c0_i32 : i32, i32
  }
  func.func @transform_6(%arg0: i32, %arg1: i32) -> (i32, i32) {
    %c0_i32 = arith.constant 0 : i32
    %c0_i32_0 = arith.constant 0 : i32
    %c0_i32_1 = arith.constant 0 : i32
    return %c0_i32, %c0_i32_0 : i32, i32
  }
  func.func @transform_7(%arg0: i32, %arg1: i32) -> (i32, i32) {
    %c0_i32 = arith.constant 0 : i32
    %c0_i32_0 = arith.constant 0 : i32
    return %arg0, %c0_i32 : i32, i32
  }
}

</mosaic_0001>

<bundles_post_ra>
// kernel: tpu_custom_call.1
= control target key start
LH: loop header
LB: loop body
LE: loop exit
PB: predicated region body
PF: predicated region fallthrough
CT: control target
= control target key end

     0   :  { %12 = vsyncpa [#allocation5], 0  ;;  %s1035_s0 = inlined_call_operand.vmem [shape: f32[16,32], index: 0, kind: input, shape index: {}]   ;;  %s1036_s1 = inlined_call_operand.vmem [shape: f32[1,32], index: 1, kind: input, shape index: {}]   ;;  %s1037_s2 = inlined_call_operand.vmem [shape: f32[1,32], index: 2, kind: input, shape index: {}]   ;;  %s1038_s3 = inlined_call_operand.vmem [shape: bf16[32,64], index: 3, kind: input, shape index: {}]   ;;  %s1039_s4 = inlined_call_operand.vmem [shape: f32[1,64], index: 4, kind: input, shape index: {}]   ;;  %s1040_s5 = inlined_call_operand.vmem [shape: bf16[64,32], index: 5, kind: input, shape index: {}]   ;;  %s1041_s6 = inlined_call_operand.vmem [shape: f32[1,32], index: 6, kind: input, shape index: {}]   ;;  %s1042_s7 = inlined_call_operand.hbm [shape: f32[16,32], index: 7, kind: output, shape index: {}]  }
   0x1   :  { %14 = vsyncpa [#allocation5 + $0x1], 0  ;;  %s897_s24 = smov 0   ;;  %s899_s25 = smov 0  }
   0x2   :  { %s901_s26 = smov 0   ;;  %s903_s27 = smov 0  }
   0x3   :  { %s905_s28 = smov 0   ;;  %s907_s29 = smov 0  }
   0x4 LB: > { %s661_s30 = sadd.s32 4294967295, %s853_s29   ;;  %s662_s8 = sadd.s32 4294967294, %s853_s29   ;;  %s853_s29 = sphi %s907_s29, %s20_s29   ;;  %s849_s28 = sphi %s905_s28, %s1049_s28   ;;  %s845_s27 = sphi %s903_s27, %s1048_s27   ;;  %s841_s26 = sphi %s901_s26, %s1047_s26   ;;  %s837_s25 = sphi %s899_s25, %s1046_s25   ;;  %s833_s24 = sphi %s897_s24, %s1045_s24  }
   0x5   : > { %s32_s9 = sadd.s32 1, %s849_s28  ;;  %s206_s10 = sadd.s32 1, %s841_s26 }
   0x6   : > { %p34_p0 = scmp.ge.s32.totalorder %s32_s9, 2  ;;  %p216_p1 = scmp.ne.s32.totalorder %s841_s26, %s837_s25 }
   0x7   : > { %p217_p2 = scmp.eq.s32.totalorder %s661_s30, 1  ;;  %p222_p3 = scmp.ne.s32.totalorder %s837_s25, %s833_s24 }
   0x8   : > { %s1051_s9 = smov (%p34_p0, %s32_s9), 0  ;;  %p223_p5 = scmp.eq.s32.totalorder %s662_s8, 1 }
   0x9   : > { %p937_p4 = por %p217_p2, %p216_p1  ;;  %s203_s12 = ssub.s32 %s849_s28, %s1051_s9 }
   0xa   : > { %p668_p6 = scmp.ge.s32.totalorder %s853_s29, 1  ;;  %p204_p7 = scmp.eq.s32.totalorder %s203_s12, 0 }
   0xb   : > { %p944_p8 = por %p223_p5, %p222_p3  ;;  %p279_p9 = scmp.lt.s32.totalorder %s853_s29, 3 }
   0xc   : > { %s950_s14 = scalar_select %p204_p7, %s841_s26, %s206_s10  }
   0xd   : > { %p280_p10 = pnand %p668_p6, %p279_p9 }
   0xe   : > { %p322_p11 = scmp.lt.s32.totalorder (!%p280_p10), %s845_s27, 1  ;;  %s319_s8 = sand.u32 (!%p280_p10), 1, %s837_s25  }
   0xf   : > { %283 = sbr.rel (%p280_p10) target bundleno = 627 (0x273), region = 48  ;;  %s669_s10 = sshll.u32 (!%p280_p10), %s319_s8, 3 }
  0x10   : > { %s699_s12 = sshll.u32 (!%p280_p10), %s845_s27, 3  ;;  %s321_s20 = scalar_lea.vmem (!%p280_p10), [#allocation4], %s669_s10 }
  0x11   : > { %s549_s21 = sshll.u32 (!%p280_p10), %s321_s20, 4  ;;  %s795_s10 = scalar_lea.hbm (!%p280_p10), %s1042_s7, 16  ;;  %s550_s21 = int_to_ptr.vmem [resolvable:$true] %s549_s21 }
  0x14   : > { %s323_s15 = scalar_select %p322_p11, %s845_s27, 1  ;;  %vm345_vm0 = vcmask 261120   ;;  %v855_v2 = vmov 32.0   ;;  %v703_v14 = vld [vmem:[%s1038_s3 + $0x8] sm:$0xff]  ;;  %v702_v16 = vld [vmem:[%s1038_s3] sm:$0xff]  ;;  %vm386_vm5 = vcmask 257024  }
  0x15   : > { %769 = vrcp.f32 %v855_v2  ;;  %420 = vmatpush.bf16.msra.mxu0 %v703_v14  ;;  %v765_v25 = vld [vmem:[%s1036_s1] ss:$0 sm:$0xff]  ;;  %v707_v40 = vld [vmem:[%s1040_s5 + $0x18] sm:$0xff]  ;;  %v706_v45 = vld [vmem:[%s1040_s5 + $0x10] sm:$0xff]  ;;  %v856_v59 = vmov 0.0   ;;  %vm505_vm10 = vcmask 523264  }
  0x16   : > { %s670_s16 = sshll.u32 %s323_s15, 3  ;;  %v766_v27 = vld [vmem:[%s1037_s2] ss:$0 sm:$0xff]  ;;  %513 = vmatpush.bf16.msra.mxu1 %v707_v40  ;;  %v705_v48 = vld [vmem:[%s1040_s5 + $0x8] sm:$0xff]  ;;  %388 = vst.msk [vmem:[#allocation3] sm:$0xff] %vm345_vm0, %v856_v59  ;;  %s537_s27 = scalar_lea.sflag [#allocation5], %s319_s8 }
  0x17   : > { %s325_s19 = scalar_lea.vmem %s1035_s0, %s670_s16  ;;  %v767_v33 = vld [vmem:[%s1039_s4] ss:$0 sm:$0xff] }
  0x18   : > { %v957_v0 = vld [vmem:[%s325_s19] sm:$0xff]  ;;  %s547_s19 = scalar_lea.hbm %s1042_s7, %s699_s12 }
  0x19   : > { %v346_v1 = vsel %vm345_vm0, %v957_v0, 0.0  ;;  %421 = vmatpush.bf16.msra.mxu0 %v702_v16  ;;  %v704_v52 = vld [vmem:[%s1040_s5] sm:$0xff]  ;;  %s551_s22 = sshll.u32 %s547_s19, 4  ;;  %s552_s22 = int_to_ptr.hbm [resolvable:$true] %s551_s22 }
  0x1a   : > { %347 = vadd.xlane.f32.xlu0 %v346_v1  ;;  %514 = vmatpush.bf16.msra.mxu1 %v706_v45  ;;  %s789_s23 = sshra.s32 %s552_s22, 4  ;;  %s790_s23 = int_to_ptr.hbm [resolvable:$true] %s789_s23 }
  0x1b   : > { %v770_v3 = vpop.eup %769  ;;  %s791_s30 = scalar_lea.hbm %s790_s23, 8  ;;  %p796_p1 = scmp.lt.s32.totalorder %s790_s23, %s1042_s7 }
  0x1c   : > { %v350_v4 = vmul.f32 32.0, %v770_v3  ;;  %vm354_vm1 = vweird.f32 %v770_v3  ;;  %p792_p12 = scmp.ne.s32.totalorder %s790_s23, %s791_s30  ;;  %p797_p2 = scmp.lt.s32.totalorder %s795_s10, %s791_s30 }
  0x1e   : > { %v351_v5 = vsub.f32 1.0, %v350_v4  ;;  %515 = vmatpush.bf16.msra.mxu1 %v705_v48  ;;  %p793_p13 = pnand %p792_p12, %p937_p4  ;;  %p798_p3 = por %p797_p2, %p796_p1 }
  0x20   : > { %v352_v6 = vmul.f32 %v770_v3, %v351_v5  ;;  %p794_p0 = pneg %p793_p13 }
  0x22   : > { %v353_v7 = vadd.f32 %v770_v3, %v352_v6  ;;  %516 = vmatpush.bf16.msra.mxu1 %v704_v52  ;;  %p799_p5 = pnand %p798_p3, %p794_p0 }
  0x24   : > { %v355_v8 = vsel %vm354_vm1, %v770_v3, %v353_v7 }
  0x8d   : > { %v348_v9 = vpop.xlane.xlu0 %347 }
  0x8e   : > { %v356_v10 = vmul.f32 %v355_v8, %v348_v9 }
  0x90   : > { %v357_v11 = vsub.f32 %v957_v0, %v356_v10 }
  0x92   : > { %v358_v12 = vmul.f32 %v357_v11, %v357_v11 }
  0x94   : > { %v359_v13 = vsel %vm345_vm0, %v358_v12, 0.0 }
  0x95   : > { %360 = vadd.xlane.f32.xlu0 %v359_v13 }
 0x108   : > { %v361_v15 = vpop.xlane.xlu0 %360 }
 0x109   : > { %v362_v17 = vmul.f32 %v361_v15, %v355_v8 }
 0x10b   : > { %v363_v18 = vadd.f32 1e-05, %v362_v17 }
 0x10d   : > { %771 = vrsqrt.f32 %v363_v18  ;;  %vm370_vm3 = vweird.f32 %v363_v18 }
 0x113   : > { %v772_v19 = vpop.eup %771 }
 0x114   : > { %v365_v20 = vmul.f32 %v772_v19, %v363_v18  ;;  %vm371_vm2 = vweird.f32 %v772_v19 }
 0x115   : > { %vm372_vm4 = vmor %vm370_vm3, %vm371_vm2 }
 0x116   : > { %v366_v21 = vmul.f32 %v772_v19, %v365_v20 }
 0x118   : > { %v367_v22 = vmul.f32 0.5, %v366_v21 }
 0x11a   : > { %v368_v23 = vsub.f32 1.5, %v367_v22  ;;  %v768_v22 = vld [vmem:[%s1041_s6] ss:$0 sm:$0xff] }
 0x11c   : > { %v369_v24 = vmul.f32 %v772_v19, %v368_v23 }
 0x11e   : > { %v373_v26 = vsel %vm372_vm4, %v772_v19, %v369_v24  ;;  %v471_v19 = vld [vmem:[#allocation3] sm:$0xff] }
 0x11f   : > { %v374_v28 = vmul.f32 %v373_v26, %v357_v11 }
 0x121   : > { %v379_v29 = vmul.f32 %v765_v25, %v374_v28 }
 0x123   : > { %v384_v30 = vadd.f32 %v766_v27, %v379_v29 }
 0x125   : > { %v385_v31 = vpack.c.bf16 %v384_v30, %v384_v30 }
 0x127   : > { %387 = vst.msk [vmem:[#allocation2] sm:$0xf] %vm386_vm5, %v385_v31 }
 0x12e   : > { %v389_v32 = vld [vmem:[#allocation2] sm:$0xf] }
 0x12f   : > { %679 = vmatmul.msk.bf16.vlgmr.msra.gmra.mxu0 %vm345_vm0, %v389_v32 }
 0x1ac   : > { %v423_v34 = vpop.f32.mrf.mxu0 }
 0x1ad   : > { %v424_v35 = vadd.f32 %v767_v33, %v423_v34 }
 0x1af   : > { %v428_v36 = vmul.f32 0.70710677, %v424_v35  ;;  %v427_v15 = vmul.f32 0.5, %v424_v35 }
 0x1b1   : > { %v429_v37 = vmul.f32 %v428_v36, %v428_v36 }
 0x1b3   : > { %v430_v38 = vmin.f32 %v429_v37, 16.0 }
 0x1b4   : > { %v425_v39 = vpop.f32.mrf.mxu0 }
 0x1b5   : > { %v431_v41 = vmul.f32 2.1237322e-06, %v430_v38  ;;  %v442_v42 = vmul.f32 3.8918573e-05, %v430_v38 }
 0x1b7   : > { %v432_v43 = vadd.f32 0.00028619796, %v431_v41  ;;  %v443_v44 = vadd.f32 0.001143296, %v442_v42 }
 0x1b9   : > { %v433_v46 = vmul.f32 %v432_v43, %v430_v38  ;;  %v444_v47 = vmul.f32 %v443_v44, %v430_v38 }
 0x1bb   : > { %v445_v49 = vadd.f32 0.014752088, %v444_v47  ;;  %v434_v50 = vadd.f32 0.0036580483, %v433_v46 }
 0x1bd   : > { %v446_v51 = vmul.f32 %v445_v49, %v430_v38  ;;  %v435_v54 = vmul.f32 %v434_v50, %v430_v38 }
 0x1bf   : > { %v447_v53 = vadd.f32 0.112945676, %v446_v51  ;;  %v436_v57 = vadd.f32 0.05243302, %v435_v54 }
 0x1c1   : > { %v448_v55 = vmul.f32 %v447_v53, %v430_v38  ;;  %v437_v61 = vmul.f32 %v436_v57, %v430_v38 }
 0x1c3   : > { %v449_v56 = vadd.f32 0.4994258, %v448_v55  ;;  %v438_v62 = vadd.f32 0.18741608, %v437_v61 }
 0x1c5   : > { %v450_v58 = vmul.f32 %v449_v56, %v430_v38  ;;  %v439_v1 = vmul.f32 %v438_v62, %v430_v38 }
 0x1c7   : > { %v451_v60 = vadd.f32 1.0, %v450_v58  ;;  %v440_v5 = vadd.f32 1.1283791, %v439_v1 }
 0x1c9   : > { %773 = vrcp.f32 %v451_v60  ;;  %v463_v4 = vand.u32 2147483648, %v451_v60  ;;  %v461_v7 = vand.u32 2147483647, %v451_v60  ;;  %vm457_vm7 = vweird.f32 %v451_v60 }
 0x1ca   : > { %v441_v10 = vmul.f32 %v440_v5, %v428_v36 }
 0x1cb   : > { %v464_v9 = vor.u32 1.1754944e-38, %v463_v4  ;;  %vm462_vm9 = vcmp.eq.f32.partialorder %v461_v7, 8.507059e+37 }
 0x1cf   : > { %v774_v63 = vpop.eup %773 }
 0x1d0   : > { %v453_v2 = vmul.f32 %v774_v63, %v451_v60  ;;  %vm458_vm6 = vweird.f32 %v774_v63 }
 0x1d1   : > { %vm459_vm8 = vmor %vm457_vm7, %vm458_vm6 }
 0x1d2   : > { %v454_v3 = vsub.f32 1.0, %v453_v2 }
 0x1d4   : > { %v455_v6 = vmul.f32 %v774_v63, %v454_v3 }
 0x1d6   : > { %v456_v8 = vadd.f32 %v774_v63, %v455_v6 }
 0x1d8   : > { %v460_v11 = vsel %vm459_vm8, %v774_v63, %v456_v8 }
 0x1d9   : > { %v465_v12 = vsel %vm462_vm9, %v464_v9, %v460_v11 }
 0x1da   : > { %v466_v13 = vmul.f32 %v465_v12, %v441_v10 }
 0x1dc   : > { %v680_v14 = vclamps-f32 %v466_v13, 1.0 }
 0x1de   : > { %v469_v16 = vadd.f32 1.0, %v680_v14 }
 0x1e0   : > { %v470_v17 = vmul.f32 %v469_v16, %v427_v15 }
 0x1e2   : > { %v472_v18 = vpack.c.bf16 %v470_v17, %v470_v17 }
 0x1e4   : > { %697 = vmatmul.msk.bf16.vlgmr.msra.gmra.mxu1 %vm505_vm10, %v472_v18 }
 0x261   : > { %v518_v20 = vpop.f32.mrf.mxu1 }
 0x262   : > { %v522_v21 = vadd.f32 %v518_v20, %v471_v19 }
 0x264   : > { %523 = vst.msk [vmem:[#allocation3] sm:$0xff] %vm345_vm0, %v522_v21 }
 0x269   : > { %v520_v23 = vpop.f32.mrf.mxu1 }
 0x26b   : > { %v527_v24 = vld [vmem:[#allocation3] sm:$0xff] }
 0x26c   : > { %v532_v25 = vadd.f32 %v768_v22, %v527_v24 }
 0x26e   : > { %v534_v26 = vadd.f32 %v532_v25, %v957_v0 }
 0x270   : > { %535 = vst.msk [vmem:[%s321_s20] sm:$0xff] %vm345_vm0, %v534_v26 }
 0x271   : > { %802 = shalt.err (!%p799_p5)
}
 0x272   : > { %708 = dma.vmem_to_hbm [thread:$0]  (%p937_p4), %s550_s21, 128, %s552_s22, %s537_s27  }
 0x273 PF: > { %p714_p6 = scmp.ge.s32.totalorder %s853_s29, 2  ;;  %s563_s8 = sand.u32 1, %s833_s24  }
 0x274   : > { %s564_s18 = scalar_lea.sflag [#allocation5], %s563_s8 }
 0x275   : > { %p711_p7 = pnand %p714_p6, %p944_p8 }
 0x277   : > { %p712_p9 = pneg %p711_p7 }
 0x279   : > { %828 = dma.done.wait (%p712_p9), %s564_s18, 128  }
 0x27a   : > { %830 = vsyncadd (%p712_p9), %s564_s18, 4294967168  ;;  %s20_s29 = sadd.s32 1, %s853_s29   ;;  %s1045_s24 = smov %s837_s25 }
 0x27b   : > { %p17_p10 = scmp.ge.s32.totalorder %s20_s29, 4   ;;  %s1046_s25 = smov %s841_s26 }
 0x27c   : > { %s1047_s26 = smov %s950_s14  ;;  %s1048_s27 = smov %s849_s28 }
 0x27d   : > { %s1049_s28 = smov %s1051_s9  ;;  %19 = sbr.rel (!%p17_p10) target bundleno = 4 (0x4), region = 100 }
 0x282   :  { %570 = vsyncpa [#allocation5], 1 }
 0x283   :  { %572 = vsyncpa [#allocation5 + $0x1], 1 }

</bundles_post_ra>
